<compile_context>
chip_gen: v7x
topology: tpu7x:2x2x1
jax: 0.10.0
libtpu: 0.0.40
codegen_flags: <defaults>
</compile_context>

<pallas_src>
import jax
import jax.numpy as jnp
from jax.experimental import pallas as pl
from jax.experimental.pallas import tpu as pltpu


def _round_up(x, m):
    return (x + m - 1) // m * m


def _largest_divisor_tile(dim, align, cap):
    """Largest multiple of `align` that divides `dim` and is <= ~cap.

    Assumes dim % align == 0 (guaranteed by wrapper-side padding)."""
    cap = max(align, cap - cap % align)
    t = min(dim, cap)
    t -= t % align
    while dim % t:
        t -= align
    return t


def _quat_to_matrix(quat_flat, negate_w):
    """(G, 4) quaternion -> (G, 9) row-major matrix of q (x) p (x) conj(q)."""
    q = quat_flat.astype(jnp.float32)
    w, x, y, z = q[:, 0], q[:, 1], q[:, 2], q[:, 3]
    if negate_w:                                      # forward: quat * [-1,1,1,1]
        w = -w
    ww, xx, yy, zz = w * w, x * x, y * y, z * z
    wx, wy, wz = w * x, w * y, w * z
    xy, xz, yz = x * y, x * z, y * z
    return jnp.stack([
        ww + xx - yy - zz, 2 * (xy - wz),     2 * (xz + wy),
        2 * (xy + wz),     ww - xx + yy - zz, 2 * (yz - wx),
        2 * (xz - wy),     2 * (yz + wx),     ww - xx - yy + zz,
    ], axis=-1)


def _rot_kernel(r_ref, ph_ref, p_ref, o_ref, coef_ref):
    """Rotate xyz-interleaved points.

    r_ref:    (Gt, 9)     per-group rotation matrices (row-major), f32
    ph_ref:   (1, L)      lane phase 0/1/2 (= lane % 3), int32, L = 3*Nt
    p_ref:    (Gt, L)     interleaved points  [x0 y0 z0 x1 y1 z1 ...]
    o_ref:    (Gt, L)     interleaved rotated points
    coef_ref: (4, Gt, L)  f32 scratch coefficient planes, rebuilt only when
                          the group tile (grid axis 0) changes.
    """
    L = p_ref.shape[-1]
    ph = ph_ref[...]
    b0 = ph == 0

    # Rebuild coefficient planes once per group tile (lane-tile axis j is the
    # inner, "arbitrary" grid axis, so j == 0 marks a new group tile).
    @pl.when(pl.program_id(1) == 0)
    def _build_coefficients():
        r = r_ref[...].astype(jnp.float32)
        b1 = ph == 1
        b2 = ph == 2
        z = jnp.float32(0.0)
        col = lambda k: r[:, k:k + 1]                 # (Gt, 1) -> lane broadcast
        # out[l] (phase c = l%3, point n = l//3) = sum_k R[c,k] * P[n,k]:
        #   c=0: R00*p[l] + R01*p[l+1] + R02*p[l+2]
        #   c=1: R11*p[l] + R12*p[l+1] + R10*p[l-1]
        #   c=2: R22*p[l] + R21*p[l-1] + R20*p[l-2]
        coef_ref[0] = jnp.where(b0, col(0), jnp.where(b1, col(4), col(8)))  # * p[l]
        coef_ref[1] = jnp.where(b0, col(1), jnp.where(b1, col(5), z))       # * p[l+1]
        coef_ref[2] = jnp.where(b1, col(3), jnp.where(b2, col(7), z))       # * p[l-1]
        coef_ref[3] = jnp.where(b0, col(2), jnp.where(b2, col(6), z))       # * p[l+-2]

    p = p_ref[...].astype(jnp.float32)
    # Lane shifts via the (otherwise idle) XLU.  Circular wrap at the tile
    # boundary is harmless: wrapped lanes always hit a zero coefficient.
    qp1 = pltpu.roll(p, (L - 1) % L, axis=1)          # p[l+1]
    qm1 = pltpu.roll(p, 1, axis=1)                    # p[l-1]
    qp2 = pltpu.roll(p, (L - 2) % L, axis=1)          # p[l+2]
    qm2 = pltpu.roll(p, 2, axis=1)                    # p[l-2]
    q_far = jnp.where(b0, qp2, qm2)                   # p[l+2] (c=0) / p[l-2] (c=2)

    out = (coef_ref[0] * p + coef_ref[1] * qp1
           + coef_ref[2] * qm1 + coef_ref[3] * q_far)
    o_ref[...] = out.astype(o_ref.dtype)


def rotation_forward(point, quat, if_backward=False, g_tile=128, n_tile=2048):
    """point: (B, NP, N, 3), quat: (B, NP, 4) -> (B, NP, N, 3)."""
    B, NP_, N, C = point.shape
    assert C == 3 and quat.shape == (B, NP_, 4)
    G = B * NP_
    dtype = point.dtype
    itemsize = jnp.dtype(dtype).itemsize

    # Per-group exact 3x3 rotation matrix of q (x) p (x) conj(q).
    R = _quat_to_matrix(quat.reshape(G, 4), negate_w=not if_backward)   # (G, 9)

    # Zero-copy interleaved view; channel de/re-interleave happens in-kernel.
    pts = point.reshape(G, 3 * N)

    # Pad (only when needed) so tiles are sublane/lane dense on every chip.
    sub_align = (8 * 4) // itemsize            # 8 for f32, 16 for bf16
    Gp = _round_up(G, sub_align)
    Np = _round_up(N, 128)                     # whole points; 3*Nt % 128 == 0
    padded = (Gp != G) or (Np != N)
    if Gp != G:
        R = jnp.pad(R, ((0, Gp - G), (0, 0)))
    if padded:
        pts = jnp.pad(pts, ((0, Gp - G), (0, 3 * (Np - N))))

    # Tile selection: big lane-dense blocks; >= 2 group tiles when possible so
    # both v7x TensorCores get work on the "parallel" axis.
    g_cap = min(g_tile, Gp // 2) if Gp >= 2 * sub_align else g_tile
    Gt = _largest_divisor_tile(Gp, sub_align, g_cap)
    Nt = _largest_divisor_tile(Np, 128, n_tile)
    L = 3 * Nt

    phase = jnp.tile(jnp.arange(3, dtype=jnp.int32), Nt).reshape(1, L)

    in_bytes = Gp * 3 * Np * itemsize + Gp * 9 * 4 + L * 4
    out_bytes = Gp * 3 * Np * itemsize

    out = pl.pallas_call(
        _rot_kernel,
        out_shape=jax.ShapeDtypeStruct((Gp, 3 * Np), dtype),
        grid=(Gp // Gt, Np // Nt),
        in_specs=[
            # Matrix / phase blocks are constant along j -> fetched once per group tile.
            pl.BlockSpec((Gt, 9), lambda i, j: (i, 0)),
            pl.BlockSpec((1, L), lambda i, j: (0, 0)),
            pl.BlockSpec((Gt, L), lambda i, j: (i, j)),
        ],
        out_specs=pl.BlockSpec((Gt, L), lambda i, j: (i, j)),
        scratch_shapes=[pltpu.VMEM((4, Gt, L), jnp.float32)],
        compiler_params=pltpu.CompilerParams(
            dimension_semantics=("parallel", "arbitrary"),
            vmem_limit_bytes=48 << 20),
        cost_estimate=pl.CostEstimate(
            flops=7 * Gp * 3 * Np,
            transcendentals=0,
            bytes_accessed=in_bytes + out_bytes),
    )(R, phase, pts)

    if padded:
        out = out[:G, :3 * N]
    return out.reshape(B, NP_, N, 3)


# ----------------- pure-JAX reference (mirrors the torch module) -------------
def _hamilton(a, b):
    aw, ax, ay, az = (a[..., i] for i in range(4))
    bw, bx, by, bz = (b[..., i] for i in range(4))
    return jnp.stack(
        [
            aw * bw - ax * bx - ay * by - az * bz,
            aw * bx + ax * bw + ay * bz - az * by,
            aw * by - ax * bz + ay * bw + az * bx,
            aw * bz + ax * by - ay * bx + az * bw,
        ],
        axis=-1,
    )


def rotation_ref(point, quat, if_backward=False):
    zero = jnp.zeros_like(point[..., :1])
    p4 = jnp.concatenate([zero, point], axis=-1)          # (B, NP, N, 4)
    if not if_backward:
        quat = quat * jnp.array([-1.0, 1.0, 1.0, 1.0], dtype=quat.dtype)
    qrep = jnp.broadcast_to(quat[:, :, None, :], p4.shape)
    qconj = qrep * jnp.array([1.0, -1.0, -1.0, -1.0], dtype=quat.dtype)
    return _hamilton(_hamilton(qrep, p4), qconj)[..., 1:4]


if __name__ == "__main__":
    key = jax.random.PRNGKey(0)
    kp, kq, kp2, kq2 = jax.random.split(key, 4)

    # Small shape consistent with the module interface (exercises padding path).
    B, NP_, N = 2, 4, 16
    point = jax.random.normal(kp, (B, NP_, N, 3), dtype=jnp.float32)
    quat = jax.random.normal(kq, (B, NP_, 4), dtype=jnp.float32)
    quat = quat / jnp.linalg.norm(quat, axis=-1, keepdims=True)  # unit quats

    out = jax.block_until_ready(rotation_forward(point, quat, if_backward=False))
    ref = rotation_ref(point, quat, if_backward=False)
    assert out.shape == (B, NP_, N, 3)
    assert jnp.allclose(out, ref, atol=1e-5, rtol=1e-5)

    out_b = jax.block_until_ready(rotation_forward(point, quat, if_backward=True))
    ref_b = rotation_ref(point, quat, if_backward=True)
    assert jnp.allclose(out_b, ref_b, atol=1e-5, rtol=1e-5)

    # Aligned shape: no-pad fast path, 2 "parallel" group tiles, and
    # coefficient-scratch reuse across several lane tiles (grid = (2, 4)).
    B2, NP2, N2 = 2, 8, 512
    point2 = jax.random.normal(kp2, (B2, NP2, N2, 3), dtype=jnp.float32)
    quat2 = jax.random.normal(kq2, (B2, NP2, 4), dtype=jnp.float32)
    quat2 = quat2 / jnp.linalg.norm(quat2, axis=-1, keepdims=True)

    out2 = jax.block_until_ready(rotation_forward(point2, quat2, n_tile=128))
    ref2 = rotation_ref(point2, quat2, if_backward=False)
    assert jnp.allclose(out2, ref2, atol=1e-4, rtol=1e-4)

    print("KERNEL_OK")
</pallas_src>

<mosaic_0001>
module attributes {stable_mosaic.version = 11 : i64} {
  func.func @_rot_kernel(%arg0: i32, %arg1: i32, %arg2: memref<8x9xf32, #tpu.memory_space<vmem>>, %arg3: memref<1x384xi32, #tpu.memory_space<vmem>>, %arg4: memref<8x384xf32, #tpu.memory_space<vmem>>, %arg5: memref<8x384xf32, #tpu.memory_space<vmem>>, %arg6: memref<4x8x384xf32, #tpu.memory_space<vmem>>) attributes {dimension_semantics = [#tpu.dimension_semantics<parallel>, #tpu.dimension_semantics<arbitrary>], iteration_bounds = array<i64: 1, 1>, scalar_prefetch = 0 : i64, scratch_operands = 1 : i64, tpu.core_type = #tpu.core_type<tc>, window_params = [{transform_indices = @transform_0, window_bounds = array<i64: 8, 9>}, {pipeline_mode = #tpu.pipeline_mode<synchronous>, transform_indices = @transform_1, window_bounds = array<i64: 1, 384>}, {transform_indices = @transform_2, window_bounds = array<i64: 8, 384>}, {transform_indices = @transform_3, window_bounds = array<i64: 8, 384>}]} {
    %c0 = arith.constant 0 : index
    %c0_0 = arith.constant 0 : index
    %0 = vector.load %arg3[%c0, %c0_0] : memref<1x384xi32, #tpu.memory_space<vmem>>, vector<1x384xi32>
    %c0_i32 = arith.constant 0 : i32
    %1 = vector.broadcast %c0_i32 : i32 to vector<1x384xi32>
    %2 = arith.cmpi eq, %0, %1 : vector<1x384xi32>
    %c0_i32_1 = arith.constant 0 : i32
    %3 = arith.cmpi eq, %arg1, %c0_i32_1 : i32
    %4 = arith.extui %3 : i1 to i32
    %c0_i32_2 = arith.constant 0 : i32
    %5 = arith.cmpi ne, %4, %c0_i32_2 : i32
    scf.if %5 {
      %c0_16 = arith.constant 0 : index
      %c0_17 = arith.constant 0 : index
      %30 = vector.load %arg2[%c0_16, %c0_17] : memref<8x9xf32, #tpu.memory_space<vmem>>, vector<8x9xf32>
      %c1_i32_18 = arith.constant 1 : i32
      %31 = vector.broadcast %c1_i32_18 : i32 to vector<1x384xi32>
      %32 = arith.cmpi eq, %0, %31 : vector<1x384xi32>
      %c2_i32_19 = arith.constant 2 : i32
      %33 = vector.broadcast %c2_i32_19 : i32 to vector<1x384xi32>
      %34 = arith.cmpi eq, %0, %33 : vector<1x384xi32>
      %35 = vector.extract_strided_slice %30 {offsets = [0, 0], sizes = [8, 1], strides = [1, 1]} : vector<8x9xf32> to vector<8x1xf32>
      %36 = vector.extract_strided_slice %30 {offsets = [0, 4], sizes = [8, 1], strides = [1, 1]} : vector<8x9xf32> to vector<8x1xf32>
      %37 = vector.extract_strided_slice %30 {offsets = [0, 8], sizes = [8, 1], strides = [1, 1]} : vector<8x9xf32> to vector<8x1xf32>
      %38 = vector.shape_cast %32 : vector<1x384xi1> to vector<1x384xi1>
      %39 = vector.broadcast %38 : vector<1x384xi1> to vector<8x384xi1>
      %40 = vector.shape_cast %36 : vector<8x1xf32> to vector<8x1xf32>
      %41 = vector.broadcast %40 : vector<8x1xf32> to vector<8x384xf32>
      %42 = vector.shape_cast %37 : vector<8x1xf32> to vector<8x1xf32>
      %43 = vector.broadcast %42 : vector<8x1xf32> to vector<8x384xf32>
      %44 = arith.select %39, %41, %43 : vector<8x384xi1>, vector<8x384xf32>
      %45 = vector.shape_cast %2 : vector<1x384xi1> to vector<1x384xi1>
      %46 = vector.broadcast %45 : vector<1x384xi1> to vector<8x384xi1>
      %47 = vector.shape_cast %35 : vector<8x1xf32> to vector<8x1xf32>
      %48 = vector.broadcast %47 : vector<8x1xf32> to vector<8x384xf32>
      %49 = arith.select %46, %48, %44 : vector<8x384xi1>, vector<8x384xf32>
      %c0_20 = arith.constant 0 : index
      %c0_21 = arith.constant 0 : index
      %c0_22 = arith.constant 0 : index
      %50 = vector.load %arg6[%c0_20, %c0_21, %c0_22] : memref<4x8x384xf32, #tpu.memory_space<vmem>>, vector<1x8x384xf32>
      %51 = vector.shape_cast %50 : vector<1x8x384xf32> to vector<8x384xf32>
      %52 = vector.shape_cast %49 : vector<8x384xf32> to vector<1x8x384xf32>
      tpu.vector_store %arg6[%c0_20, %c0_21, %c0_22], %52 {strides = array<i32>} : memref<4x8x384xf32, #tpu.memory_space<vmem>>, vector<1x8x384xf32>,
      %53 = vector.extract_strided_slice %30 {offsets = [0, 1], sizes = [8, 1], strides = [1, 1]} : vector<8x9xf32> to vector<8x1xf32>
      %54 = vector.extract_strided_slice %30 {offsets = [0, 5], sizes = [8, 1], strides = [1, 1]} : vector<8x9xf32> to vector<8x1xf32>
      %cst = arith.constant 0.000000e+00 : f32
      %55 = vector.shape_cast %32 : vector<1x384xi1> to vector<1x384xi1>
      %56 = vector.broadcast %55 : vector<1x384xi1> to vector<8x384xi1>
      %57 = vector.shape_cast %54 : vector<8x1xf32> to vector<8x1xf32>
      %58 = vector.broadcast %57 : vector<8x1xf32> to vector<8x384xf32>
      %59 = vector.broadcast %cst : f32 to vector<8x384xf32>
      %60 = arith.select %56, %58, %59 : vector<8x384xi1>, vector<8x384xf32>
      %61 = vector.shape_cast %2 : vector<1x384xi1> to vector<1x384xi1>
      %62 = vector.broadcast %61 : vector<1x384xi1> to vector<8x384xi1>
      %63 = vector.shape_cast %53 : vector<8x1xf32> to vector<8x1xf32>
      %64 = vector.broadcast %63 : vector<8x1xf32> to vector<8x384xf32>
      %65 = arith.select %62, %64, %60 : vector<8x384xi1>, vector<8x384xf32>
      %c1_23 = arith.constant 1 : index
      %c0_24 = arith.constant 0 : index
      %c0_25 = arith.constant 0 : index
      %66 = vector.load %arg6[%c1_23, %c0_24, %c0_25] : memref<4x8x384xf32, #tpu.memory_space<vmem>>, vector<1x8x384xf32>
      %67 = vector.shape_cast %66 : vector<1x8x384xf32> to vector<8x384xf32>
      %68 = vector.shape_cast %65 : vector<8x384xf32> to vector<1x8x384xf32>
      tpu.vector_store %arg6[%c1_23, %c0_24, %c0_25], %68 {strides = array<i32>} : memref<4x8x384xf32, #tpu.memory_space<vmem>>, vector<1x8x384xf32>,
      %69 = vector.extract_strided_slice %30 {offsets = [0, 3], sizes = [8, 1], strides = [1, 1]} : vector<8x9xf32> to vector<8x1xf32>
      %70 = vector.extract_strided_slice %30 {offsets = [0, 7], sizes = [8, 1], strides = [1, 1]} : vector<8x9xf32> to vector<8x1xf32>
      %cst_26 = arith.constant 0.000000e+00 : f32
      %71 = vector.shape_cast %34 : vector<1x384xi1> to vector<1x384xi1>
      %72 = vector.broadcast %71 : vector<1x384xi1> to vector<8x384xi1>
      %73 = vector.shape_cast %70 : vector<8x1xf32> to vector<8x1xf32>
      %74 = vector.broadcast %73 : vector<8x1xf32> to vector<8x384xf32>
      %75 = vector.broadcast %cst_26 : f32 to vector<8x384xf32>
      %76 = arith.select %72, %74, %75 : vector<8x384xi1>, vector<8x384xf32>
      %77 = vector.shape_cast %32 : vector<1x384xi1> to vector<1x384xi1>
      %78 = vector.broadcast %77 : vector<1x384xi1> to vector<8x384xi1>
      %79 = vector.shape_cast %69 : vector<8x1xf32> to vector<8x1xf32>
      %80 = vector.broadcast %79 : vector<8x1xf32> to vector<8x384xf32>
      %81 = arith.select %78, %80, %76 : vector<8x384xi1>, vector<8x384xf32>
      %c2_27 = arith.constant 2 : index
      %c0_28 = arith.constant 0 : index
      %c0_29 = arith.constant 0 : index
      %82 = vector.load %arg6[%c2_27, %c0_28, %c0_29] : memref<4x8x384xf32, #tpu.memory_space<vmem>>, vector<1x8x384xf32>
      %83 = vector.shape_cast %82 : vector<1x8x384xf32> to vector<8x384xf32>
      %84 = vector.shape_cast %81 : vector<8x384xf32> to vector<1x8x384xf32>
      tpu.vector_store %arg6[%c2_27, %c0_28, %c0_29], %84 {strides = array<i32>} : memref<4x8x384xf32, #tpu.memory_space<vmem>>, vector<1x8x384xf32>,
      %85 = vector.extract_strided_slice %30 {offsets = [0, 2], sizes = [8, 1], strides = [1, 1]} : vector<8x9xf32> to vector<8x1xf32>
      %86 = vector.extract_strided_slice %30 {offsets = [0, 6], sizes = [8, 1], strides = [1, 1]} : vector<8x9xf32> to vector<8x1xf32>
      %cst_30 = arith.constant 0.000000e+00 : f32
      %87 = vector.shape_cast %34 : vector<1x384xi1> to vector<1x384xi1>
      %88 = vector.broadcast %87 : vector<1x384xi1> to vector<8x384xi1>
      %89 = vector.shape_cast %86 : vector<8x1xf32> to vector<8x1xf32>
      %90 = vector.broadcast %89 : vector<8x1xf32> to vector<8x384xf32>
      %91 = vector.broadcast %cst_30 : f32 to vector<8x384xf32>
      %92 = arith.select %88, %90, %91 : vector<8x384xi1>, vector<8x384xf32>
      %93 = vector.shape_cast %2 : vector<1x384xi1> to vector<1x384xi1>
      %94 = vector.broadcast %93 : vector<1x384xi1> to vector<8x384xi1>
      %95 = vector.shape_cast %85 : vector<8x1xf32> to vector<8x1xf32>
      %96 = vector.broadcast %95 : vector<8x1xf32> to vector<8x384xf32>
      %97 = arith.select %94, %96, %92 : vector<8x384xi1>, vector<8x384xf32>
      %c3_31 = arith.constant 3 : index
      %c0_32 = arith.constant 0 : index
      %c0_33 = arith.constant 0 : index
      %98 = vector.load %arg6[%c3_31, %c0_32, %c0_33] : memref<4x8x384xf32, #tpu.memory_space<vmem>>, vector<1x8x384xf32>
      %99 = vector.shape_cast %98 : vector<1x8x384xf32> to vector<8x384xf32>
      %100 = vector.shape_cast %97 : vector<8x384xf32> to vector<1x8x384xf32>
      tpu.vector_store %arg6[%c3_31, %c0_32, %c0_33], %100 {strides = array<i32>} : memref<4x8x384xf32, #tpu.memory_space<vmem>>, vector<1x8x384xf32>,
    } else {
    }
    %c0_3 = arith.constant 0 : index
    %c0_4 = arith.constant 0 : index
    %6 = vector.load %arg4[%c0_3, %c0_4] : memref<8x384xf32, #tpu.memory_space<vmem>>, vector<8x384xf32>
    %c383_i32 = arith.constant 383 : i32
    %7 = tpu.dynamic_rotate %6 by %c383_i32 dim 1 : vector<8x384xf32>, i32 -> vector<8x384xf32>
    %c1_i32 = arith.constant 1 : i32
    %8 = tpu.dynamic_rotate %6 by %c1_i32 dim 1 : vector<8x384xf32>, i32 -> vector<8x384xf32>
    %c382_i32 = arith.constant 382 : i32
    %9 = tpu.dynamic_rotate %6 by %c382_i32 dim 1 : vector<8x384xf32>, i32 -> vector<8x384xf32>
    %c2_i32 = arith.constant 2 : i32
    %10 = tpu.dynamic_rotate %6 by %c2_i32 dim 1 : vector<8x384xf32>, i32 -> vector<8x384xf32>
    %11 = vector.shape_cast %2 : vector<1x384xi1> to vector<1x384xi1>
    %12 = vector.broadcast %11 : vector<1x384xi1> to vector<8x384xi1>
    %13 = arith.select %12, %9, %10 : vector<8x384xi1>, vector<8x384xf32>
    %c0_5 = arith.constant 0 : index
    %c0_6 = arith.constant 0 : index
    %c0_7 = arith.constant 0 : index
    %14 = vector.load %arg6[%c0_5, %c0_6, %c0_7] : memref<4x8x384xf32, #tpu.memory_space<vmem>>, vector<1x8x384xf32>
    %15 = vector.shape_cast %14 : vector<1x8x384xf32> to vector<8x384xf32>
    %16 = arith.mulf %15, %6 : vector<8x384xf32>
    %c1 = arith.constant 1 : index
    %c0_8 = arith.constant 0 : index
    %c0_9 = arith.constant 0 : index
    %17 = vector.load %arg6[%c1, %c0_8, %c0_9] : memref<4x8x384xf32, #tpu.memory_space<vmem>>, vector<1x8x384xf32>
    %18 = vector.shape_cast %17 : vector<1x8x384xf32> to vector<8x384xf32>
    %19 = arith.mulf %18, %7 : vector<8x384xf32>
    %20 = arith.addf %16, %19 : vector<8x384xf32>
    %c2 = arith.constant 2 : index
    %c0_10 = arith.constant 0 : index
    %c0_11 = arith.constant 0 : index
    %21 = vector.load %arg6[%c2, %c0_10, %c0_11] : memref<4x8x384xf32, #tpu.memory_space<vmem>>, vector<1x8x384xf32>
    %22 = vector.shape_cast %21 : vector<1x8x384xf32> to vector<8x384xf32>
    %23 = arith.mulf %22, %8 : vector<8x384xf32>
    %24 = arith.addf %20, %23 : vector<8x384xf32>
    %c3 = arith.constant 3 : index
    %c0_12 = arith.constant 0 : index
    %c0_13 = arith.constant 0 : index
    %25 = vector.load %arg6[%c3, %c0_12, %c0_13] : memref<4x8x384xf32, #tpu.memory_space<vmem>>, vector<1x8x384xf32>
    %26 = vector.shape_cast %25 : vector<1x8x384xf32> to vector<8x384xf32>
    %27 = arith.mulf %26, %13 : vector<8x384xf32>
    %28 = arith.addf %24, %27 : vector<8x384xf32>
    %c0_14 = arith.constant 0 : index
    %c0_15 = arith.constant 0 : index
    %29 = vector.load %arg5[%c0_14, %c0_15] : memref<8x384xf32, #tpu.memory_space<vmem>>, vector<8x384xf32>
    tpu.vector_store %arg5[%c0_14, %c0_15], %28 {strides = array<i32>} : memref<8x384xf32, #tpu.memory_space<vmem>>, vector<8x384xf32>,
    return
  }
  func.func @transform_0(%arg0: i32, %arg1: i32) -> (i32, i32) {
    %c0_i32 = arith.constant 0 : i32
    %c0_i32_0 = arith.constant 0 : i32
    return %arg0, %c0_i32 : i32, i32
  }
  func.func @transform_1(%arg0: i32, %arg1: i32) -> (i32, i32) {
    %c0_i32 = arith.constant 0 : i32
    %c0_i32_0 = arith.constant 0 : i32
    %c0_i32_1 = arith.constant 0 : i32
    return %c0_i32, %c0_i32_0 : i32, i32
  }
  func.func @transform_2(%arg0: i32, %arg1: i32) -> (i32, i32) {
    %c0_i32 = arith.constant 0 : i32
    return %arg0, %arg1 : i32, i32
  }
  func.func @transform_3(%arg0: i32, %arg1: i32) -> (i32, i32) {
    %c0_i32 = arith.constant 0 : i32
    return %arg0, %arg1 : i32, i32
  }
}

</mosaic_0001>

<bundles_post_ra>
// kernel: tpu_custom_call.1
= control target key start
LH: loop header
LB: loop body
LE: loop exit
PB: predicated region body
PF: predicated region fallthrough
CT: control target
= control target key end

     0   :  { %8 = vsyncpa [#allocation4], 0  ;;  %s646_s0 = inlined_call_operand.hbm [shape: f32[8,9], index: 0, kind: input, shape index: {}]   ;;  %s647_s1 = inlined_call_operand.vmem [shape: s32[1,384], index: 1, kind: input, shape index: {}]   ;;  %s648_s2 = inlined_call_operand.hbm [shape: f32[8,384], index: 2, kind: input, shape index: {}]   ;;  %s649_s3 = inlined_call_operand.hbm [shape: f32[8,384], index: 3, kind: output, shape index: {}]  }
   0x1   :  { %9 = vsyncpa [#allocation7], 0 }
   0x2   :  { %10 = vsyncpa [#allocation5], 0  ;;  %s388_s12 = smov [#allocation3]   ;;  %s389_s14 = smov [#allocation6]  }
   0x3   :  { %s17_s13 = sshll.u32 %s388_s12, 4  ;;  %s29_s15 = sshll.u32 %s389_s14, 4  ;;  %s18_s13 = int_to_ptr.vmem [resolvable:$true] %s17_s13  ;;  %s30_s15 = int_to_ptr.vmem [resolvable:$true] %s29_s15 }
   0x4   :  { %s316_s18 = scalar_lea.hbm %s646_s0, 128 }
   0x5   :  { %p317_p0 = scmp.ne.s32.totalorder %s646_s0, %s316_s18  ;;  %p320_p1 = scmp.lt.u32.totalorder %s316_s18, %s646_s0 }
   0x7   :  { %p322_p2 = pnand %p320_p1, %p317_p0 }
   0x9   :  { %325 = shalt.err (!%p322_p2)
}
   0xa   :  { %s326_s23 = scalar_lea.vmem %s18_s13, 128  ;;  %p331_p4 = scmp.lt.s32.totalorder %s18_s13, %s18_s13 }
   0xb   :  { %p327_p3 = scmp.ne.s32.totalorder %s18_s13, %s326_s23  ;;  %p332_p5 = scmp.lt.s32.totalorder %s326_s23, %s326_s23 }
   0xd   :  { %p333_p6 = por %p332_p5, %p331_p4 }
   0xf   :  { %p334_p7 = pnand %p333_p6, %p327_p3 }
  0x11   :  { %337 = shalt.err (!%p334_p7)
}
  0x12   :  { %20 = dma.hbm_to_vmem [thread:$0]  %s646_s0, 128, %s18_s13, [#allocation4]  }
  0x13   :  { %s338_s28 = scalar_lea.hbm %s648_s2, 384 }
  0x14   :  { %p339_p8 = scmp.ne.s32.totalorder %s648_s2, %s338_s28  ;;  %p342_p9 = scmp.lt.u32.totalorder %s338_s28, %s648_s2 }
  0x16   :  { %p344_p10 = pnand %p342_p9, %p339_p8 }
  0x18   :  { %347 = shalt.err (!%p344_p10)
}
  0x19   :  { %s348_s6 = scalar_lea.vmem %s30_s15, 384  ;;  %p353_p12 = scmp.lt.s32.totalorder %s30_s15, %s30_s15 }
  0x1a   :  { %p349_p11 = scmp.ne.s32.totalorder %s30_s15, %s348_s6  ;;  %p354_p13 = scmp.lt.s32.totalorder %s348_s6, %s348_s6 }
  0x1c   :  { %p355_p0 = por %p354_p13, %p353_p12 }
  0x1e   :  { %p356_p1 = pnand %p355_p0, %p349_p11 }
  0x20   :  { %359 = shalt.err (!%p356_p1)
}
  0x21   :  { %32 = dma.hbm_to_vmem [thread:$0]  %s648_s2, 384, %s30_s15, [#allocation7]  }
  0x22   :  { %382 = dma.done.wait [#allocation4], 128  }
  0x23   :  { %383 = vsyncadd [#allocation4], 4294967168 }
  0x24   :  { %384 = dma.done.wait [#allocation7], 384  }
  0x25   :  { %385 = vsyncadd [#allocation7], 4294966912  ;;  %v390_v0 = vmov 5   ;;  %v391_v1 = vmov 4   ;;  %v45_v2 = vld [vmem:[#allocation3] sm:$0xff]  ;;  %v392_v3 = vmov 0   ;;  %v49_v21 = vlaneseq }
  0x26   :  { %309 = vset.pattern.permute.xlu1 %v390_v0  ;;  %307 = vset.pattern.permute.xlu0 %v391_v1  ;;  %v393_v4 = vmov 8   ;;  %v394_v5 = vmov 1   ;;  %v395_v6 = vmov 7   ;;  %v396_v7 = vmov 3   ;;  %v449_v9 = vld [vmem:[#allocation6 + $0x10] sm:$0xff]  ;;  %s399_s2 = smov 127  }
  0x27   :  { %103 = vperm.xlu1 %309, %v45_v2   ;;  %66 = vperm.xlu0 %307, %v45_v2   ;;  %v397_v8 = vmov 2   ;;  %v398_v10 = vmov 6   ;;  %v452_v11 = vld [vmem:[#allocation6] sm:$0xff]  ;;  %v454_v12 = vld [vmem:[#allocation6 + $0x8] sm:$0xff]  ;;  %s400_s8 = smov 1   ;;  %s401_s9 = smov 126  }
  0x28   :  { %s402_s10 = smov 2   ;;  %v39_v22 = vld [vmem:[%s647_s1] sm:$0x7]  ;;  %v50_v25 = vshrl.u32 %v49_v21, 7  ;;  %v493_v47 = vand.u32 127, %v49_v21  ;;  %s403_s1 = smov [#allocation8]  }
  0x29   :  { %vm46_vm0 = vcmp.eq.s32.totalorder %v39_v22, 1  ;;  %vm40_vm1 = vcmp.eq.s32.totalorder %v39_v22, 0  ;;  %vm47_vm2 = vcmp.eq.s32.totalorder %v39_v22, 2  ;;  %s281_s13 = sshll.u32 %s403_s1, 4  ;;  %s282_s13 = int_to_ptr.vmem [resolvable:$true] %s281_s13 }
  0x2a   :  { %v59_v28 = vsub.s32 2, %v50_v25  ;;  %v51_v29 = vsub.s32 0, %v50_v25  ;;  %v48_v30 = vsel %vm46_vm0, 1, %v392_v3  ;;  %v55_v31 = vsub.s32 1, %v50_v25  ;;  %s360_s14 = scalar_lea.vmem %s282_s13, 384  ;;  %p365_p3 = scmp.lt.s32.totalorder %s282_s13, %s282_s13 }
  0x2b   :  { %310 = vset.pattern.permute.xlu1 %v392_v3  ;;  %308 = vset.pattern.permute.xlu0 %v393_v4  ;;  %v76_v32 = vsel %vm40_vm1, 1, %v392_v3  ;;  %v120_v35 = vsel %vm47_vm2, 1, %v392_v3  ;;  %vm183_vm12 = vcmp.lt.s32.totalorder %v493_v47, 127  ;;  %vm193_vm13 = vcmp.lt.s32.totalorder %v493_v47, 1  ;;  %p361_p2 = scmp.ne.s32.totalorder %s282_s13, %s360_s14  ;;  %p366_p4 = scmp.lt.s32.totalorder %s360_s14, %s360_s14 }
  0x2c   :  { %93 = vperm.xlu1 %310, %v45_v2   ;;  %70 = vperm.xlu0 %308, %v45_v2   ;;  %v60_v34 = vrot.slane %v48_v30, %v59_v28  ;;  %v88_v36 = vrot.slane %v76_v32, %v59_v28  ;;  %v52_v37 = vrot.slane %v48_v30, %v51_v29  ;;  %vm203_vm14 = vcmp.lt.s32.totalorder %v493_v47, 126 }
  0x2d   :  { %v80_v39 = vrot.slane %v76_v32, %v51_v29  ;;  %v84_v40 = vrot.slane %v76_v32, %v55_v31  ;;  %v56_v41 = vrot.slane %v48_v30, %v55_v31  ;;  %v124_v42 = vrot.slane %v120_v35, %v51_v29  ;;  %p367_p5 = por %p366_p4, %p365_p3 }
  0x2e   :  { %v128_v43 = vrot.slane %v120_v35, %v55_v31  ;;  %v132_v44 = vrot.slane %v120_v35, %v59_v28  ;;  %vm489_vm3 = vcmp.eq.s32.totalorder %v60_v34, 1  ;;  %vm495_vm4 = vcmp.eq.s32.totalorder %v52_v37, 1 }
  0x2f   :  { %vm501_vm5 = vcmp.eq.s32.totalorder %v88_v36, 1  ;;  %vm505_vm6 = vcmp.eq.s32.totalorder %v56_v41, 1  ;;  %vm511_vm7 = vcmp.eq.s32.totalorder %v80_v39, 1  ;;  %vm515_vm8 = vcmp.eq.s32.totalorder %v84_v40, 1  ;;  %p368_p6 = pnand %p367_p5, %p361_p2 }
  0x30   :  { %311 = vset.pattern.permute.xlu1 %v394_v5  ;;  %312 = vset.pattern.permute.xlu0 %v395_v6  ;;  %vm521_vm9 = vcmp.eq.s32.totalorder %v124_v42, 1  ;;  %vm525_vm10 = vcmp.eq.s32.totalorder %v128_v43, 1  ;;  %vm529_vm11 = vcmp.eq.s32.totalorder %v132_v44, 1  ;;  %vm213_vm15 = vcmp.lt.s32.totalorder %v493_v47, 2 }
  0x31   :  { %110 = vperm.xlu1 %311, %v45_v2   ;;  %137 = vperm.xlu0 %312, %v45_v2  }
  0x35   :  { %313 = vset.pattern.permute.xlu1 %v396_v7  ;;  %315 = vset.pattern.permute.xlu0 %v397_v8 }
  0x36   :  { %144 = vperm.xlu1 %313, %v45_v2   ;;  %162 = vperm.xlu0 %315, %v45_v2  }
  0x3a   :  { %314 = vset.pattern.permute.xlu1 %v398_v10  ;;  %179 = vrot.lane.b32.xlu0 %v449_v9, %s399_s2 }
  0x3b   :  { %155 = vperm.xlu1 %314, %v45_v2  }
  0x3e   :  { %189 = vrot.lane.b32.xlu0 %v454_v12, %s400_s8 }
  0x3f   :  { %175 = vrot.lane.b32.xlu1 %v452_v11, %s399_s2 }
  0x42   :  { %197 = vrot.lane.b32.xlu0 %v452_v11, %s401_s9 }
  0x43   :  { %177 = vrot.lane.b32.xlu1 %v454_v12, %s399_s2 }
  0x46   :  { %201 = vrot.lane.b32.xlu0 %v449_v9, %s401_s9 }
  0x47   :  { %187 = vrot.lane.b32.xlu1 %v452_v11, %s400_s8 }
  0x4a   :  { %209 = vrot.lane.b32.xlu0 %v454_v12, %s402_s10 }
  0x4b   :  { %191 = vrot.lane.b32.xlu1 %v449_v9, %s400_s8 }
  0x4f   :  { %199 = vrot.lane.b32.xlu1 %v454_v12, %s401_s9 }
  0x53   :  { %207 = vrot.lane.b32.xlu1 %v452_v11, %s402_s10 }
  0x57   :  { %211 = vrot.lane.b32.xlu1 %v449_v9, %s402_s10 }
  0xa6   :  { %v467_v13 = vpop.permute.xlu1 %103  ;;  %v67_v14 = vpop.permute.xlu0 %66 }
  0xa7   :  { %v106_v62 = vsel %vm495_vm4, %v467_v13, 0.0  ;;  %v107_v1 = vsel %vm505_vm6, %v467_v13, 0.0  ;;  %v108_v2 = vsel %vm489_vm3, %v467_v13, 0.0 }
  0xab   :  { %v94_v15 = vpop.permute.xlu1 %93  ;;  %v71_v16 = vpop.permute.xlu0 %70 }
  0xac   :  { %v75_v49 = vsel %vm489_vm3, %v67_v14, %v71_v16  ;;  %v73_v52 = vsel %vm495_vm4, %v67_v14, %v71_v16  ;;  %v74_v55 = vsel %vm505_vm6, %v67_v14, %v71_v16 }
  0xad   :  { %v98_v61 = vsel %vm501_vm5, %v94_v15, %v75_v49  ;;  %v96_v63 = vsel %vm511_vm7, %v94_v15, %v73_v52  ;;  %v97_v3 = vsel %vm515_vm8, %v94_v15, %v74_v55 }
  0xae   :  { %v241_v7 = vmul.f32 %v449_v9, %v98_v61  ;;  %v239_v15 = vmul.f32 %v452_v11, %v96_v63 }
  0xb0   :  { %v469_v17 = vpop.permute.xlu1 %110  ;;  %v471_v18 = vpop.permute.xlu0 %137 }
  0xb1   :  { %v141_v4 = vsel %vm525_vm10, %v471_v18, 0.0  ;;  %v114_v5 = vsel %vm515_vm8, %v469_v17, %v107_v1  ;;  %v140_v6 = vsel %vm521_vm9, %v471_v18, 0.0  ;;  %v113_v21 = vsel %vm511_vm7, %v469_v17, %v106_v62 }
  0xb2   :  { %v142_v9 = vsel %vm529_vm11, %v471_v18, 0.0  ;;  %v115_v11 = vsel %vm501_vm5, %v469_v17, %v108_v2 }
  0xb5   :  { %v473_v19 = vpop.permute.xlu1 %144  ;;  %v475_v20 = vpop.permute.xlu0 %162 }
  0xb6   :  { %v148_v22 = vsel %vm505_vm6, %v473_v19, %v141_v4  ;;  %v149_v17 = vsel %vm489_vm3, %v473_v19, %v142_v9 }
  0xb9   :  { %v180_v24 = vpop.permute.xlu0 %179 }
  0xba   :  { %v480_v23 = vpop.permute.xlu1 %155 }
  0xbb   :  { %v159_v28 = vsel %vm525_vm10, %v480_v23, 0.0  ;;  %v158_v36 = vsel %vm521_vm9, %v480_v23, 0.0 }
  0xbc   :  { %v166_v37 = vsel %vm515_vm8, %v475_v20, %v159_v28  ;;  %v165_v52 = vsel %vm511_vm7, %v475_v20, %v158_v36 }
  0xbd   :  { %v482_v27 = vpop.permute.xlu0 %189 }
  0xbe   :  { %v176_v26 = vpop.permute.xlu1 %175 }
  0xbf   :  { %v186_v13 = vsel %vm183_vm12, %v180_v24, %v176_v26 }
  0xc0   :  { %v248_v29 = vmul.f32 %v186_v13, %v115_v11 }
  0xc1   :  { %v487_v38 = vpop.permute.xlu0 %197 }
  0xc2   :  { %v178_v33 = vpop.permute.xlu1 %177  ;;  %v251_v43 = vadd.f32 %v248_v29, %v241_v7 }
  0xc3   :  { %v184_v0 = vsel %vm183_vm12, %v178_v33, %v180_v24  ;;  %v185_v14 = vsel %vm183_vm12, %v176_v26, %v178_v33  ;;  %v240_v24 = vmul.f32 %v454_v12, %v97_v3  ;;  %v147_v26 = vsel %vm495_vm4, %v473_v19, %v140_v6 }
  0xc4   :  { %v247_v16 = vmul.f32 %v184_v0, %v114_v5  ;;  %v246_v30 = vmul.f32 %v185_v14, %v113_v21 }
  0xc5   :  { %v202_v60 = vpop.permute.xlu0 %201 }
  0xc6   :  { %v188_v45 = vpop.permute.xlu1 %187  ;;  %v250_v33 = vadd.f32 %v247_v16, %v240_v24  ;;  %v249_v44 = vadd.f32 %v246_v30, %v239_v15 }
  0xc7   :  { %v195_v8 = vsel %vm193_vm13, %v188_v45, %v482_v27 }
  0xc8   :  { %v257_v18 = vmul.f32 %v195_v8, %v148_v22 }
  0xc9   :  { %v210_v25 = vpop.permute.xlu0 %209 }
  0xca   :  { %v192_v59 = vpop.permute.xlu1 %191  ;;  %v260_v39 = vadd.f32 %v257_v18, %v250_v33 }
  0xcb   :  { %v194_v12 = vsel %vm193_vm13, %v482_v27, %v192_v59  ;;  %v196_v31 = vsel %vm193_vm13, %v192_v59, %v188_v45  ;;  %v160_v27 = vsel %vm529_vm11, %v480_v23, 0.0  ;;  %v206_v45 = vsel %vm203_vm14, %v202_v60, %v487_v38 }
  0xcc   :  { %v256_v40 = vmul.f32 %v196_v31, %v147_v26  ;;  %v258_v41 = vmul.f32 %v194_v12, %v149_v17  ;;  %v167_v54 = vsel %vm501_vm5, %v475_v20, %v160_v27 }
  0xce   :  { %v200_v10 = vpop.permute.xlu1 %199  ;;  %v259_v56 = vadd.f32 %v256_v40, %v249_v44  ;;  %v261_v57 = vadd.f32 %v258_v41, %v251_v43 }
  0xcf   :  { %v204_v34 = vsel %vm203_vm14, %v200_v10, %v202_v60  ;;  %v205_v23 = vsel %vm203_vm14, %v487_v38, %v200_v10 }
  0xd2   :  { %v208_v32 = vpop.permute.xlu1 %207 }
  0xd3   :  { %v215_v35 = vsel %vm213_vm15, %v208_v32, %v210_v25 }
  0xd4   :  { %v234_v19 = vsel %vm515_vm8, %v204_v34, %v215_v35 }
  0xd5   :  { %v267_v42 = vmul.f32 %v234_v19, %v166_v37 }
  0xd6   :  { %v212_v46 = vpop.permute.xlu1 %211 }
  0xd7   :  { %v270_v48 = vadd.f32 %v267_v42, %v260_v39  ;;  %v214_v49 = vsel %vm213_vm15, %v210_v25, %v212_v46  ;;  %v216_v51 = vsel %vm213_vm15, %v212_v46, %v208_v32 }
  0xd8   :  { %v233_v55 = vsel %vm511_vm7, %v205_v23, %v216_v51  ;;  %v235_v38 = vsel %vm501_vm5, %v206_v45, %v214_v49 }
  0xd9   :  { %273 = vst [vmem:[#allocation8 + $0x8] sm:$0xff] %v270_v48  ;;  %v266_v47 = vmul.f32 %v233_v55, %v165_v52  ;;  %v268_v58 = vmul.f32 %v235_v38, %v167_v54 }
  0xdb   :  { %v269_v59 = vadd.f32 %v266_v47, %v259_v56  ;;  %v271_v60 = vadd.f32 %v268_v58, %v261_v57 }
  0xdd   :  { %272 = vst [vmem:[#allocation8] sm:$0xff] %v269_v59  ;;  %274 = vst [vmem:[#allocation8 + $0x10] sm:$0xff] %v271_v60 }
  0xde   :  { %371 = shalt.err (!%p368_p6)
}
  0xdf   :  { %s372_s17 = scalar_lea.hbm %s649_s3, 384 }
  0xe0   :  { %p373_p7 = scmp.ne.s32.totalorder %s649_s3, %s372_s17  ;;  %p376_p8 = scmp.lt.u32.totalorder %s372_s17, %s649_s3 }
  0xe2   :  { %p378_p9 = pnand %p376_p8, %p373_p7 }
  0xe4   :  { %381 = shalt.err (!%p378_p9)
}
  0xe5   :  { %284 = dma.vmem_to_hbm [thread:$0]  %s282_s13, 384, %s649_s3, [#allocation5]  }
  0xe6   :  { %386 = dma.done.wait [#allocation5], 384  }
  0xe7   :  { %387 = vsyncadd [#allocation5], 4294966912 }
  0xe8   :  { %288 = vsyncpa [#allocation4], 1 }
  0xe9   :  { %289 = vsyncpa [#allocation7], 1 }
  0xea   :  { %290 = vsyncpa [#allocation5], 1 }

</bundles_post_ra>
